<compile_context>
chip_gen: v7x
topology: tpu7x:2x2x1
jax: 0.10.0
libtpu: 0.0.40
codegen_flags: <defaults>
</compile_context>

<pallas_src>
import functools

import jax
import jax.numpy as jnp
from jax import lax
from jax.experimental import pallas as pl
from jax.experimental.pallas import tpu as pltpu

DEFAULT_TRUNC_STD = 0.02
LN_EPS = 1e-5
_MIB = 1024 * 1024


def _round_up(a: int, b: int) -> int:
    return (a + b - 1) // b * b


def _tpu_vmem_bytes() -> int:
    """Physical VMEM per TensorCore (128 MiB on v5e/v6e, 64 MiB on v7x)."""
    default = 128 * _MIB
    try:
        info = pltpu.get_tpu_info()
        return int(getattr(info, "vmem_capacity_bytes", default) or default)
    except Exception:
        return default


def _ln_mlp_kernel(x_ref, lnw_ref, lnb_ref, w1_ref, b1_ref, w2_ref, b2_ref,
                   o_ref, xn_ref, acc_ref, *, h_real: int):
    """Grid = (row tiles, FFN tiles). The FFN axis (last, 'arbitrary') produces
    fc1 output columns tile-by-tile and reduces them for fc2 into acc_ref."""
    j = pl.program_id(1)

    # --- first FFN step for this row tile: LayerNorm + accumulator init ---
    @pl.when(j == 0)
    def _():
        x = x_ref[...].astype(jnp.float32)                 # (TM, Hp), x streamed bf16
        hp = x.shape[-1]
        if h_real == hp:
            mean = jnp.mean(x, axis=-1, keepdims=True)
            xc = x - mean
            var = jnp.mean(xc * xc, axis=-1, keepdims=True)
        else:
            # Lanes >= h_real are zero padding; keep LN statistics exact over H.
            lane = lax.broadcasted_iota(jnp.int32, x.shape, 1)
            mask = lane < h_real
            inv_h = 1.0 / float(h_real)
            mean = jnp.sum(x, axis=-1, keepdims=True) * inv_h
            xc = jnp.where(mask, x - mean, 0.0)
            var = jnp.sum(xc * xc, axis=-1, keepdims=True) * inv_h
        xn = xc * lax.rsqrt(var + LN_EPS)
        xn = xn * lnw_ref[...] + lnb_ref[...]              # padded ln params are 0
        # xn store->reload on the j==0 step is a known 1/(Fp/tf)-frequency cost;
        # accepted (low single-digit %) to keep the fc1 dot path uniform across j.
        xn_ref[...] = xn.astype(xn_ref.dtype)              # bf16 MXU operand
        acc_ref[...] = jnp.zeros_like(acc_ref)

    # --- fc1 tile: (TM, Hp) @ (Hp, TF) + b1 tile; activation kept in f32 ---
    h = jnp.dot(xn_ref[...], w1_ref[...],
                preferred_element_type=jnp.float32) + b1_ref[...]
    h = jnp.maximum(h, 0.0)
    h = h * h                                              # srelu = squared ReLU
    # dropout(p=0.0) / eval mode -> identity
    # TODO(synk): training-mode dropout (p>0) would need pltpu.prng_* in-kernel.

    # --- fc2 partial product for this FFN tile, accumulated in f32 ---
    acc_ref[...] += jnp.dot(h.astype(w2_ref.dtype), w2_ref[...],
                            preferred_element_type=jnp.float32)

    # --- last FFN step: add bias, cast, store (lane-dense: Hp % 128 == 0) ---
    @pl.when(j == pl.num_programs(1) - 1)
    def _():
        o_ref[...] = (acc_ref[...] + b2_ref[...]).astype(o_ref.dtype)


def prepare_params(ln_w, ln_b, fc1_w, fc1_b, fc2_w, fc2_b, *, tf=None,
                   matmul_dtype=jnp.bfloat16):
    """One-time weight prep (transpose + zero-pad + bf16 cast), kept out of the
    per-call path so serving does not re-stream weight copies through HBM."""
    F, H = fc1_w.shape
    Hp = _round_up(H, 128)
    vmem_cap = _tpu_vmem_bytes()
    wb = jnp.dtype(matmul_dtype).itemsize

    if tf is None:
        # Fewer FFN reduction steps (less f32 accumulator RMW + ~0.35 us grid-step
        # overhead) when VMEM is plentiful (v5e/v6e, 128 MiB); keep 512 on the
        # 64-MiB part (v7x) so the larger row tile still fits.
        tf = 512 if vmem_cap <= 64 * _MIB else 1024
    tf = max(128, _round_up(int(tf), 128))
    tf = min(tf, _round_up(F, 128))
    # Keep the double-buffered weight tiles under ~half the usable VMEM so the
    # row tile (the arithmetic-intensity lever) gets the remaining budget.
    while tf > 128 and 4 * Hp * tf * wb > (vmem_cap - 8 * _MIB) // 2:
        tf //= 2
    tf = max(128, _round_up(tf, 128))
    Fp = _round_up(F, tf)

    def pad2(a, shape, dtype):
        out = jnp.zeros(shape, dtype)
        return out.at[: a.shape[0], : a.shape[1]].set(a.astype(dtype))

    w1 = pad2(jnp.asarray(fc1_w).T, (Hp, Fp), matmul_dtype)           # (Hp, Fp)
    w2 = pad2(jnp.asarray(fc2_w).T, (Fp, Hp), matmul_dtype)           # (Fp, Hp)
    b1 = pad2(jnp.asarray(fc1_b).reshape(1, F), (1, Fp), jnp.float32)
    b2 = pad2(jnp.asarray(fc2_b).reshape(1, H), (1, Hp), jnp.float32)
    lnw = pad2(jnp.asarray(ln_w).reshape(1, H), (1, Hp), jnp.float32)
    lnb = pad2(jnp.asarray(ln_b).reshape(1, H), (1, Hp), jnp.float32)
    return {"lnw": lnw, "lnb": lnb, "w1": w1, "b1": b1, "w2": w2, "b2": b2,
            "h": H, "f": F, "tf": tf}


def layer_norm_mlp(x, params, *, tm=None, out_dtype=None):
    """x: (..., H). params from prepare_params(). Fused LN + MLP forward."""
    H, F = params["h"], params["f"]
    w1, w2 = params["w1"], params["w2"]
    Hp, Fp = w1.shape
    tf = params["tf"]
    assert x.shape[-1] == H

    out_dtype = jnp.dtype(out_dtype) if out_dtype is not None else x.dtype
    lead = x.shape[:-1]
    M = 1
    for d in lead:
        M *= d

    vmem_cap = _tpu_vmem_bytes()
    cap_eff = max(32 * _MIB, vmem_cap - 8 * _MIB)     # headroom for Mosaic scratch
    xb = jnp.dtype(w1.dtype).itemsize                 # x streamed in the MXU dtype
    ob = jnp.dtype(out_dtype).itemsize
    wb = jnp.dtype(w1.dtype).itemsize

    if tm is None:
        # Arithmetic intensity w.r.t. streamed weights is ~tm flops/weight byte.
        # Balance points: v6e ~918 TF/s / 1.4 TB/s ~ 650+, v5e ~240,
        # v7x (per TC) ~310 -> 1024 on the 128-MiB parts, 512 on v7x (64 MiB).
        tm = 512 if vmem_cap <= 64 * _MIB else 1024
    tm = max(16, _round_up(int(tm), 16))

    def vmem_need(tm_, n_wbuf=2):
        return (2 * tm_ * Hp * xb                 # x input tiles (double-buffered)
                + 2 * tm_ * Hp * ob               # out tiles
                + n_wbuf * 2 * Hp * tf * wb       # w1 / w2 tiles
                + 2 * (2 * tf + 4 * Hp) * 4       # b1, b2, lnw, lnb (tiny)
                + tm_ * Hp * (wb + 4))            # xn + f32 accumulator scratch

    # Clamp (not assert) for small inputs; rows are zero-padded, not required
    # to divide tm. Shrink tm until the working set fits this generation's VMEM.
    tm_eff = min(tm, _round_up(M, 16))
    while tm_eff > 64 and vmem_need(tm_eff) > cap_eff:
        tm_eff = max(64, _round_up(tm_eff // 2, 16))

    # v7x has 2 TensorCores: make sure the "parallel" row axis has >= 2 tiles so
    # both cores get work (each TC re-streams weights; per-TC ~3.2 TB/s absorbs it).
    if vmem_cap <= 64 * _MIB and M >= 32 and _round_up(M, tm_eff) == tm_eff:
        tm_eff = max(16, _round_up((M + 1) // 2, 16))

    M_pad = _round_up(M, tm_eff)
    n_row_tiles = M_pad // tm_eff
    grid = (n_row_tiles, Fp // tf)

    # 3-deep weight pipeline hides the weight-tile refetch bubble at each row-tile
    # boundary; only worth it when boundaries exist and VMEM (v5e/v6e) has room.
    deep_wbuf = (n_row_tiles >= 2 and vmem_cap >= 100 * _MIB
                 and vmem_need(tm_eff, n_wbuf=3) <= cap_eff)
    n_wbuf = 3 if deep_wbuf else 2

    x2d = x.reshape(M, H).astype(w1.dtype)        # bf16 streaming: halves x traffic
    xp = jnp.pad(x2d, ((0, M_pad - M), (0, Hp - H)))

    need = vmem_need(tm_eff, n_wbuf)
    vmem_limit = int(min(cap_eff, max(32 * _MIB, need + 4 * _MIB)))

    cost = pl.CostEstimate(
        flops=int(4 * M * H * F),
        transcendentals=int(M),
        # Weights are re-streamed once per row tile.
        bytes_accessed=int(M_pad * Hp * (xb + ob) + n_row_tiles * 2 * Hp * Fp * wb),
    )

    kernel = functools.partial(_ln_mlp_kernel, h_real=H)

    if deep_wbuf:
        w1_spec = pl.BlockSpec((Hp, tf), lambda i, j: (0, j),
                               pipeline_mode=pl.Buffered(3))
        w2_spec = pl.BlockSpec((tf, Hp), lambda i, j: (j, 0),
                               pipeline_mode=pl.Buffered(3))
    else:
        w1_spec = pl.BlockSpec((Hp, tf), lambda i, j: (0, j))
        w2_spec = pl.BlockSpec((tf, Hp), lambda i, j: (j, 0))

    out2d = pl.pallas_call(
        kernel,
        out_shape=jax.ShapeDtypeStruct((M_pad, Hp), out_dtype),
        grid_spec=pltpu.PrefetchScalarGridSpec(
            num_scalar_prefetch=0,
            grid=grid,
            in_specs=[
                pl.BlockSpec((tm_eff, Hp), lambda i, j: (i, 0)),  # x rows (bf16)
                pl.BlockSpec((1, Hp), lambda i, j: (0, 0)),       # ln weight
                pl.BlockSpec((1, Hp), lambda i, j: (0, 0)),       # ln bias
                w1_spec,                                          # w1^T tile
                pl.BlockSpec((1, tf), lambda i, j: (0, j)),       # b1 tile
                w2_spec,                                          # w2^T tile
                pl.BlockSpec((1, Hp), lambda i, j: (0, 0)),       # b2
            ],
            out_specs=pl.BlockSpec((tm_eff, Hp), lambda i, j: (i, 0)),
            scratch_shapes=[
                pltpu.VMEM((tm_eff, Hp), w1.dtype),    # normalized x (MXU lhs)
                pltpu.VMEM((tm_eff, Hp), jnp.float32), # fc2 f32 accumulator
            ],
        ),
        compiler_params=pltpu.CompilerParams(
            dimension_semantics=("parallel", "arbitrary"),
            vmem_limit_bytes=vmem_limit,
        ),
        cost_estimate=cost,
    )(xp, params["lnw"], params["lnb"], w1, params["b1"], w2, params["b2"])

    return out2d[:M, :H].reshape(*lead, H)


def _trunc_normal(key, shape, std):
    # matches torch.nn.init.trunc_normal_(std=std) with default bounds (-2, 2) in std units
    return std * jax.random.truncated_normal(key, -2.0, 2.0, shape, jnp.float32)


def _reference(x, ln_w, ln_b, fc1_w, fc1_b, fc2_w, fc2_b):
    mean = jnp.mean(x, axis=-1, keepdims=True)
    var = jnp.mean((x - mean) ** 2, axis=-1, keepdims=True)
    xn = (x - mean) * lax.rsqrt(var + LN_EPS) * ln_w + ln_b
    h = xn @ fc1_w.T + fc1_b
    h = jnp.maximum(h, 0.0) ** 2  # srelu = squared ReLU
    return h @ fc2_w.T + fc2_b


if __name__ == "__main__":
    # Small shapes consistent with the module: hidden=32, ffn_hidden=64.
    batch, seq, hidden, ffn = 2, 8, 32, 64

    key = jax.random.PRNGKey(0)
    kx, k1, k2 = jax.random.split(key, 3)

    x = jax.random.normal(kx, (batch, seq, hidden), jnp.float32)

    # Deterministic parameter init mirroring LayerNormMLP.reset_parameters()
    fc1_w = _trunc_normal(k1, (ffn, hidden), DEFAULT_TRUNC_STD)   # (ffn_hidden, hidden)
    fc1_b = jnp.zeros((ffn,), jnp.float32)
    fc2_w = _trunc_normal(k2, (hidden, ffn), DEFAULT_TRUNC_STD)   # (hidden, ffn_hidden)
    fc2_b = jnp.zeros((hidden,), jnp.float32)
    ln_w = jnp.ones((hidden,), jnp.float32)
    ln_b = jnp.zeros((hidden,), jnp.float32)

    params = prepare_params(ln_w, ln_b, fc1_w, fc1_b, fc2_w, fc2_b)
    out = layer_norm_mlp(x, params)
    out = jax.block_until_ready(out)

    ref = _reference(x, ln_w, ln_b, fc1_w, fc1_b, fc2_w, fc2_b)
    assert out.shape == (batch, seq, hidden)
    # bf16 streamed x + bf16 MXU operands (f32 LN stats / activation / accumulation).
    assert jnp.allclose(out, ref, atol=1e-3, rtol=5e-2), "mismatch vs JAX reference"

    print("KERNEL_OK")
</pallas_src>

<mosaic_0001>
module attributes {stable_mosaic.version = 11 : i64} {
  func.func @_ln_mlp_kernel(%arg0: i32, %arg1: i32, %arg2: memref<16x128xbf16, #tpu.memory_space<vmem>>, %arg3: memref<1x128xf32, #tpu.memory_space<vmem>>, %arg4: memref<1x128xf32, #tpu.memory_space<vmem>>, %arg5: memref<128x128xbf16, #tpu.memory_space<vmem>>, %arg6: memref<1x128xf32, #tpu.memory_space<vmem>>, %arg7: memref<128x128xbf16, #tpu.memory_space<vmem>>, %arg8: memref<1x128xf32, #tpu.memory_space<vmem>>, %arg9: memref<16x128xf32, #tpu.memory_space<vmem>>, %arg10: memref<16x128xbf16, #tpu.memory_space<vmem>>, %arg11: memref<16x128xf32, #tpu.memory_space<vmem>>) attributes {dimension_semantics = [#tpu.dimension_semantics<parallel>, #tpu.dimension_semantics<arbitrary>], iteration_bounds = array<i64: 1, 1>, scalar_prefetch = 0 : i64, scratch_operands = 2 : i64, tpu.core_type = #tpu.core_type<tc>, window_params = [{transform_indices = @transform_0, window_bounds = array<i64: 16, 128>}, {pipeline_mode = #tpu.pipeline_mode<synchronous>, transform_indices = @transform_1, window_bounds = array<i64: 1, 128>}, {pipeline_mode = #tpu.pipeline_mode<synchronous>, transform_indices = @transform_2, window_bounds = array<i64: 1, 128>}, {transform_indices = @transform_3, window_bounds = array<i64: 128, 128>}, {transform_indices = @transform_4, window_bounds = array<i64: 1, 128>}, {transform_indices = @transform_5, window_bounds = array<i64: 128, 128>}, {pipeline_mode = #tpu.pipeline_mode<synchronous>, transform_indices = @transform_6, window_bounds = array<i64: 1, 128>}, {transform_indices = @transform_7, window_bounds = array<i64: 16, 128>}]} {
    %c0_i32 = arith.constant 0 : i32
    %0 = arith.cmpi eq, %arg1, %c0_i32 : i32
    %1 = arith.extui %0 : i1 to i32
    %c0_i32_0 = arith.constant 0 : i32
    %2 = arith.cmpi ne, %1, %c0_i32_0 : i32
    scf.if %2 {
      %c0_16 = arith.constant 0 : index
      %c0_17 = arith.constant 0 : index
      %21 = vector.load %arg2[%c0_16, %c0_17] : memref<16x128xbf16, #tpu.memory_space<vmem>>, vector<16x128xbf16>
      %22 = arith.extf %21 : vector<16x128xbf16> to vector<16x128xf32>
      %23 = tpu.iota {dimensions = array<i32: 1>} : vector<16x128xi32>
      %c32_i32 = arith.constant 32 : i32
      %24 = vector.broadcast %c32_i32 : i32 to vector<16x128xi32>
      %25 = arith.cmpi slt, %23, %24 : vector<16x128xi32>
      %cst_18 = arith.constant dense<0.000000e+00> : vector<16xf32>
      %26 = vector.multi_reduction <add>, %22, %cst_18 [1] : vector<16x128xf32> to vector<16xf32>
      %27 = vector.shape_cast %26 : vector<16xf32> to vector<16x1xf32>
      %cst_19 = arith.constant 3.125000e-02 : f32
      %28 = vector.broadcast %cst_19 : f32 to vector<16x1xf32>
      %29 = arith.mulf %27, %28 : vector<16x1xf32>
      %30 = vector.broadcast %29 : vector<16x1xf32> to vector<16x128xf32>
      %31 = arith.subf %22, %30 : vector<16x128xf32>
      %cst_20 = arith.constant 0.000000e+00 : f32
      %32 = vector.broadcast %cst_20 : f32 to vector<16x128xf32>
      %33 = arith.select %25, %31, %32 : vector<16x128xi1>, vector<16x128xf32>
      %34 = arith.mulf %33, %33 : vector<16x128xf32>
      %cst_21 = arith.constant dense<0.000000e+00> : vector<16xf32>
      %35 = vector.multi_reduction <add>, %34, %cst_21 [1] : vector<16x128xf32> to vector<16xf32>
      %36 = vector.shape_cast %35 : vector<16xf32> to vector<16x1xf32>
      %cst_22 = arith.constant 3.125000e-02 : f32
      %37 = vector.broadcast %cst_22 : f32 to vector<16x1xf32>
      %38 = arith.mulf %36, %37 : vector<16x1xf32>
      %cst_23 = arith.constant 9.99999974E-6 : f32
      %39 = vector.broadcast %cst_23 : f32 to vector<16x1xf32>
      %40 = arith.addf %38, %39 : vector<16x1xf32>
      %41 = math.rsqrt %40 : vector<16x1xf32>
      %42 = vector.broadcast %41 : vector<16x1xf32> to vector<16x128xf32>
      %43 = arith.mulf %33, %42 : vector<16x128xf32>
      %c0_24 = arith.constant 0 : index
      %c0_25 = arith.constant 0 : index
      %44 = vector.load %arg3[%c0_24, %c0_25] : memref<1x128xf32, #tpu.memory_space<vmem>>, vector<1x128xf32>
      %45 = vector.broadcast %44 : vector<1x128xf32> to vector<16x128xf32>
      %46 = arith.mulf %43, %45 : vector<16x128xf32>
      %c0_26 = arith.constant 0 : index
      %c0_27 = arith.constant 0 : index
      %47 = vector.load %arg4[%c0_26, %c0_27] : memref<1x128xf32, #tpu.memory_space<vmem>>, vector<1x128xf32>
      %48 = vector.broadcast %47 : vector<1x128xf32> to vector<16x128xf32>
      %49 = arith.addf %46, %48 : vector<16x128xf32>
      %50 = arith.truncf %49 : vector<16x128xf32> to vector<16x128xbf16>
      %c0_28 = arith.constant 0 : index
      %c0_29 = arith.constant 0 : index
      %51 = vector.load %arg10[%c0_28, %c0_29] : memref<16x128xbf16, #tpu.memory_space<vmem>>, vector<16x128xbf16>
      tpu.vector_store %arg10[%c0_28, %c0_29], %50 {strides = array<i32>} : memref<16x128xbf16, #tpu.memory_space<vmem>>, vector<16x128xbf16>,
      %cst_30 = arith.constant 0.000000e+00 : f32
      %52 = vector.broadcast %cst_30 : f32 to vector<16x128xf32>
      %c0_31 = arith.constant 0 : index
      %c0_32 = arith.constant 0 : index
      %53 = vector.load %arg11[%c0_31, %c0_32] : memref<16x128xf32, #tpu.memory_space<vmem>>, vector<16x128xf32>
      tpu.vector_store %arg11[%c0_31, %c0_32], %52 {strides = array<i32>} : memref<16x128xf32, #tpu.memory_space<vmem>>, vector<16x128xf32>,
    } else {
    }
    %c0 = arith.constant 0 : index
    %c0_1 = arith.constant 0 : index
    %3 = vector.load %arg10[%c0, %c0_1] : memref<16x128xbf16, #tpu.memory_space<vmem>>, vector<16x128xbf16>
    %c0_2 = arith.constant 0 : index
    %c0_3 = arith.constant 0 : index
    %4 = vector.load %arg5[%c0_2, %c0_3] : memref<128x128xbf16, #tpu.memory_space<vmem>>, vector<128x128xbf16>
    %cst = arith.constant dense<0.000000e+00> : vector<16x128xf32>
    %5 = tpu.matmul %3, %4, %cst {dimension_numbers = #tpu.dot_dimension_numbers<[1], [0], [0], [1], [0, 0, 1, 1], [], []>} : vector<16x128xbf16>, vector<128x128xbf16>, vector<16x128xf32> -> vector<16x128xf32>
    %c0_4 = arith.constant 0 : index
    %c0_5 = arith.constant 0 : index
    %6 = vector.load %arg6[%c0_4, %c0_5] : memref<1x128xf32, #tpu.memory_space<vmem>>, vector<1x128xf32>
    %7 = vector.broadcast %6 : vector<1x128xf32> to vector<16x128xf32>
    %8 = arith.addf %5, %7 : vector<16x128xf32>
    %cst_6 = arith.constant 0.000000e+00 : f32
    %9 = vector.broadcast %cst_6 : f32 to vector<16x128xf32>
    %10 = arith.maximumf %8, %9 : vector<16x128xf32>
    %11 = arith.mulf %10, %10 : vector<16x128xf32>
    %c0_7 = arith.constant 0 : index
    %c0_8 = arith.constant 0 : index
    %12 = vector.load %arg11[%c0_7, %c0_8] : memref<16x128xf32, #tpu.memory_space<vmem>>, vector<16x128xf32>
    %13 = arith.truncf %11 : vector<16x128xf32> to vector<16x128xbf16>
    %c0_9 = arith.constant 0 : index
    %c0_10 = arith.constant 0 : index
    %14 = vector.load %arg7[%c0_9, %c0_10] : memref<128x128xbf16, #tpu.memory_space<vmem>>, vector<128x128xbf16>
    %cst_11 = arith.constant dense<0.000000e+00> : vector<16x128xf32>
    %15 = tpu.matmul %13, %14, %cst_11 {dimension_numbers = #tpu.dot_dimension_numbers<[1], [0], [0], [1], [0, 0, 1, 1], [], []>} : vector<16x128xbf16>, vector<128x128xbf16>, vector<16x128xf32> -> vector<16x128xf32>
    %16 = arith.addf %12, %15 : vector<16x128xf32>
    %c0_12 = arith.constant 0 : index
    %c0_13 = arith.constant 0 : index
    %17 = vector.load %arg11[%c0_12, %c0_13] : memref<16x128xf32, #tpu.memory_space<vmem>>, vector<16x128xf32>
    tpu.vector_store %arg11[%c0_12, %c0_13], %16 {strides = array<i32>} : memref<16x128xf32, #tpu.memory_space<vmem>>, vector<16x128xf32>,
    %c0_i32_14 = arith.constant 0 : i32
    %18 = arith.cmpi eq, %arg1, %c0_i32_14 : i32
    %19 = arith.extui %18 : i1 to i32
    %c0_i32_15 = arith.constant 0 : i32
    %20 = arith.cmpi ne, %19, %c0_i32_15 : i32
    scf.if %20 {
      %c0_16 = arith.constant 0 : index
      %c0_17 = arith.constant 0 : index
      %21 = vector.load %arg11[%c0_16, %c0_17] : memref<16x128xf32, #tpu.memory_space<vmem>>, vector<16x128xf32>
      %c0_18 = arith.constant 0 : index
      %c0_19 = arith.constant 0 : index
      %22 = vector.load %arg8[%c0_18, %c0_19] : memref<1x128xf32, #tpu.memory_space<vmem>>, vector<1x128xf32>
      %23 = vector.broadcast %22 : vector<1x128xf32> to vector<16x128xf32>
      %24 = arith.addf %21, %23 : vector<16x128xf32>
      %c0_20 = arith.constant 0 : index
      %c0_21 = arith.constant 0 : index
      %25 = vector.load %arg9[%c0_20, %c0_21] : memref<16x128xf32, #tpu.memory_space<vmem>>, vector<16x128xf32>
      tpu.vector_store %arg9[%c0_20, %c0_21], %24 {strides = array<i32>} : memref<16x128xf32, #tpu.memory_space<vmem>>, vector<16x128xf32>,
    } else {
    }
    return
  }
  func.func @transform_0(%arg0: i32, %arg1: i32) -> (i32, i32) {
    %c0_i32 = arith.constant 0 : i32
    %c0_i32_0 = arith.constant 0 : i32
    return %arg0, %c0_i32 : i32, i32
  }
  func.func @transform_1(%arg0: i32, %arg1: i32) -> (i32, i32) {
    %c0_i32 = arith.constant 0 : i32
    %c0_i32_0 = arith.constant 0 : i32
    %c0_i32_1 = arith.constant 0 : i32
    return %c0_i32, %c0_i32_0 : i32, i32
  }
  func.func @transform_2(%arg0: i32, %arg1: i32) -> (i32, i32) {
    %c0_i32 = arith.constant 0 : i32
    %c0_i32_0 = arith.constant 0 : i32
    %c0_i32_1 = arith.constant 0 : i32
    return %c0_i32, %c0_i32_0 : i32, i32
  }
  func.func @transform_3(%arg0: i32, %arg1: i32) -> (i32, i32) {
    %c0_i32 = arith.constant 0 : i32
    %c0_i32_0 = arith.constant 0 : i32
    return %c0_i32, %arg1 : i32, i32
  }
  func.func @transform_4(%arg0: i32, %arg1: i32) -> (i32, i32) {
    %c0_i32 = arith.constant 0 : i32
    %c0_i32_0 = arith.constant 0 : i32
    return %c0_i32, %arg1 : i32, i32
  }
  func.func @transform_5(%arg0: i32, %arg1: i32) -> (i32, i32) {
    %c0_i32 = arith.constant 0 : i32
    %c0_i32_0 = arith.constant 0 : i32
    return %arg1, %c0_i32 : i32, i32
  }
  func.func @transform_6(%arg0: i32, %arg1: i32) -> (i32, i32) {
    %c0_i32 = arith.constant 0 : i32
    %c0_i32_0 = arith.constant 0 : i32
    %c0_i32_1 = arith.constant 0 : i32
    return %c0_i32, %c0_i32_0 : i32, i32
  }
  func.func @transform_7(%arg0: i32, %arg1: i32) -> (i32, i32) {
    %c0_i32 = arith.constant 0 : i32
    %c0_i32_0 = arith.constant 0 : i32
    return %arg0, %c0_i32 : i32, i32
  }
}

</mosaic_0001>

<bundles_post_ra>
// kernel: tpu_custom_call.1
= control target key start
LH: loop header
LB: loop body
LE: loop exit
PB: predicated region body
PF: predicated region fallthrough
CT: control target
= control target key end

     0   :  { %12 = vsyncpa [#allocation5], 0  ;;  %s739_s0 = inlined_call_operand.hbm [shape: bf16[16,128], index: 0, kind: input, shape index: {}]   ;;  %s740_s1 = inlined_call_operand.vmem [shape: f32[1,128], index: 1, kind: input, shape index: {}]   ;;  %s741_s2 = inlined_call_operand.vmem [shape: f32[1,128], index: 2, kind: input, shape index: {}]   ;;  %s742_s3 = inlined_call_operand.hbm [shape: bf16[128,128], index: 3, kind: input, shape index: {}]   ;;  %s743_s4 = inlined_call_operand.vmem [shape: f32[1,128], index: 4, kind: input, shape index: {}]   ;;  %s744_s5 = inlined_call_operand.hbm [shape: bf16[128,128], index: 5, kind: input, shape index: {}]   ;;  %s745_s6 = inlined_call_operand.vmem [shape: f32[1,128], index: 6, kind: input, shape index: {}]   ;;  %s746_s7 = inlined_call_operand.hbm [shape: f32[16,128], index: 7, kind: output, shape index: {}]  }
   0x1   :  { %13 = vsyncpa [#allocation8], 0 }
   0x2   :  { %14 = vsyncpa [#allocation6], 0  ;;  %s595_s24 = smov [#allocation7]   ;;  %s596_s26 = smov [#allocation4]  }
   0x3   :  { %s36_s25 = sshll.u32 %s595_s24, 4  ;;  %s20_s27 = sshll.u32 %s596_s26, 4  ;;  %s37_s25 = int_to_ptr.vmem [resolvable:$true] %s36_s25  ;;  %s645_s27 = int_to_ptr.vmem [resolvable:$true] %s20_s27 }
   0x4   :  { %s501_s30 = scalar_lea.hbm %s742_s3, 1024 }
   0x5   :  { %p502_p0 = scmp.ne.s32.totalorder %s742_s3, %s501_s30  ;;  %p505_p1 = scmp.lt.u32.totalorder %s501_s30, %s742_s3 }
   0x7   :  { %p507_p2 = pnand %p505_p1, %p502_p0 }
   0x9   :  { %510 = shalt.err (!%p507_p2)
}
   0xa   :  { %s511_s12 = scalar_lea.vmem %s37_s25, 1024  ;;  %p516_p4 = scmp.lt.s32.totalorder %s37_s25, %s37_s25 }
   0xb   :  { %p512_p3 = scmp.ne.s32.totalorder %s37_s25, %s511_s12  ;;  %p517_p5 = scmp.lt.s32.totalorder %s511_s12, %s511_s12 }
   0xd   :  { %p518_p6 = por %p517_p5, %p516_p4 }
   0xf   :  { %p519_p7 = pnand %p518_p6, %p512_p3 }
  0x11   :  { %522 = shalt.err (!%p519_p7)
}
  0x12   :  { %s597_s13 = smov 64   ;;  %s598_s14 = smov 4  }
  0x13   :  { %42 = dma.hbm_to_vmem [thread:$0]  %s742_s3, 1024, %s37_s25, [#allocation8], %s597_s13, %s597_s13, %s598_s14  }
  0x14   :  { %s523_s19 = scalar_lea.hbm %s739_s0, 128 }
  0x15   :  { %p524_p8 = scmp.ne.s32.totalorder %s739_s0, %s523_s19  ;;  %p527_p9 = scmp.lt.u32.totalorder %s523_s19, %s739_s0 }
  0x17   :  { %p529_p10 = pnand %p527_p9, %p524_p8 }
  0x19   :  { %532 = shalt.err (!%p529_p10)
}
  0x1a   :  { %s533_s24 = scalar_lea.vmem %s645_s27, 128  ;;  %p538_p12 = scmp.lt.s32.totalorder %s645_s27, %s645_s27 }
  0x1b   :  { %p534_p11 = scmp.ne.s32.totalorder %s645_s27, %s533_s24  ;;  %p539_p13 = scmp.lt.s32.totalorder %s533_s24, %s533_s24 }
  0x1d   :  { %p540_p0 = por %p539_p13, %p538_p12 }
  0x1f   :  { %p541_p1 = pnand %p540_p0, %p534_p11 }
  0x21   :  { %544 = shalt.err (!%p541_p1)
}
  0x22   :  { %26 = dma.hbm_to_vmem [thread:$0]  %s739_s0, 128, %s645_s27, [#allocation5], %s597_s13, %s597_s13, %s598_s14  }
  0x23   :  { %s599_s26 = smov [#allocation9]   ;;  %s545_s8 = scalar_lea.hbm %s744_s5, 1024 }
  0x24   :  { %s50_s28 = sshll.u32 %s599_s26, 4  ;;  %p546_p2 = scmp.ne.s32.totalorder %s744_s5, %s545_s8  ;;  %s51_s28 = int_to_ptr.vmem [resolvable:$true] %s50_s28 }
  0x25   :  { %p549_p3 = scmp.lt.u32.totalorder %s545_s8, %s744_s5 }
  0x27   :  { %p551_p4 = pnand %p549_p3, %p546_p2 }
  0x29   :  { %554 = shalt.err (!%p551_p4)
}
  0x2a   :  { %s555_s15 = scalar_lea.vmem %s51_s28, 1024  ;;  %p560_p6 = scmp.lt.s32.totalorder %s51_s28, %s51_s28 }
  0x2b   :  { %p556_p5 = scmp.ne.s32.totalorder %s51_s28, %s555_s15  ;;  %p561_p7 = scmp.lt.s32.totalorder %s555_s15, %s555_s15 }
  0x2d   :  { %p562_p8 = por %p561_p7, %p560_p6 }
  0x2f   :  { %p563_p9 = pnand %p562_p8, %p556_p5 }
  0x31   :  { %566 = shalt.err (!%p563_p9)
}
  0x32   :  { %56 = dma.hbm_to_vmem [thread:$0]  %s744_s5, 1024, %s51_s28, [#allocation8], %s597_s13, %s597_s13, %s598_s14  }
  0x33   :  { %589 = dma.done.wait [#allocation5], 128  }
  0x34   :  { %590 = vsyncadd [#allocation5], 4294967168 }
  0x35   :  { %591 = dma.done.wait [#allocation8], 2048  }
  0x36   :  { %592 = vsyncadd [#allocation8], 4294965248  ;;  %v410_v0 = vld [vmem:[#allocation4] sm:$0xff]   ;;  %v481_v3 = vld [vmem:[#allocation7] sm:$0xff]   ;;  %v600_v4 = vmov 0.0   ;;  %v77_v5 = vlaneseq  ;;  %vm601_vm1 = vmmov 0  }
  0x37   :  { %v411_v1 = vunpack.c.l.bf16 %v410_v0  ;;  %v412_v2 = vunpack.c.h.bf16 %v410_v0  ;;  %431 = vmatprep.subr.bf16.mxu0 %v600_v4  ;;  %451 = vmatprep.subr.bf16.mxu1 %v600_v4  ;;  %v482_v17 = vld [vmem:[#allocation7 + $0x8] sm:$0xff]   ;;  %v483_v18 = vld [vmem:[#allocation7 + $0x10] sm:$0xff]   ;;  %v484_v19 = vld [vmem:[#allocation7 + $0x18] sm:$0xff]   ;;  %s602_s19 = smov [#allocation10]  }
  0x38   :  { %432 = vmatpush3.bf16.msra.mxu0 %v481_v3  ;;  %v78_v6 = vand.u32 127, %v77_v5  ;;  %v485_v20 = vld [vmem:[#allocation7 + $0x20] sm:$0xff]   ;;  %447 = vmatprep.mubr.msk.bf16.mxu0 %vm601_vm1, %v600_v4  ;;  %v486_v21 = vld [vmem:[#allocation7 + $0x28] sm:$0xff]   ;;  %v487_v22 = vld [vmem:[#allocation7 + $0x30] sm:$0xff]   ;;  %s376_s20 = sshll.u32 %s602_s19, 4  ;;  %s377_s20 = int_to_ptr.vmem [resolvable:$true] %s376_s20 }
  0x39   :  { %80 = vadd.xlane.f32.xlu0 %v411_v1  ;;  %433 = vmatprep.subr.bf16.mxu0 %v600_v4  ;;  %v488_v23 = vld [vmem:[#allocation7 + $0x38] sm:$0xff]   ;;  %v489_v24 = vld [vmem:[#allocation9] sm:$0xff]   ;;  %v490_v25 = vld [vmem:[#allocation9 + $0x8] sm:$0xff]   ;;  %p572_p11 = scmp.lt.s32.totalorder %s377_s20, %s377_s20 }
  0x3a   :  { %vm79_vm0 = vcmp.lt.s32.totalorder %v78_v6, 32  ;;  %467 = vmatprep.mubr.msk.bf16.mxu1 %vm601_vm1, %v600_v4  ;;  %452 = vmatpush3.bf16.msra.mxu1 %v489_v24  ;;  %v491_v26 = vld [vmem:[#allocation9 + $0x10] sm:$0xff]   ;;  %v492_v27 = vld [vmem:[#allocation9 + $0x18] sm:$0xff]   ;;  %v493_v28 = vld [vmem:[#allocation9 + $0x20] sm:$0xff]  }
  0x3b   :  { %453 = vmatprep.subr.bf16.mxu1 %v600_v4  ;;  %v389_v37 = vld [vmem:[%s740_s1] ss:$0 sm:$0xff]  ;;  %v494_v46 = vld [vmem:[#allocation9 + $0x28] sm:$0xff]   ;;  %v495_v47 = vld [vmem:[#allocation9 + $0x30] sm:$0xff]  }
  0x3c   :  { %434 = vmatpush3.bf16.msra.mxu0 %v482_v17  ;;  %v390_v41 = vld [vmem:[%s741_s2] ss:$0 sm:$0xff] }
  0x3d   :  { %82 = vadd.xlane.f32.xlu0 %v412_v2  ;;  %435 = vmatprep.subr.bf16.mxu0 %v600_v4  ;;  %v496_v48 = vld [vmem:[#allocation9 + $0x38] sm:$0xff]  }
  0x3e   :  { %454 = vmatpush3.bf16.msra.mxu1 %v490_v25  ;;  %v391_v49 = vld [vmem:[%s743_s4] ss:$0 sm:$0xff]  ;;  %s567_s4 = scalar_lea.vmem %s377_s20, 256 }
  0x3f   :  { %455 = vmatprep.subr.bf16.mxu1 %v600_v4  ;;  %v408_v61 = vld [vmem:[%s745_s6] ss:$0 sm:$0xff]  ;;  %p568_p10 = scmp.ne.s32.totalorder %s377_s20, %s567_s4  ;;  %p573_p12 = scmp.lt.s32.totalorder %s567_s4, %s567_s4 }
  0x40   :  { %436 = vmatpush3.bf16.msra.mxu0 %v483_v18 }
  0x41   :  { %437 = vmatprep.subr.bf16.mxu0 %v600_v4  ;;  %p574_p13 = por %p573_p12, %p572_p11 }
  0x42   :  { %456 = vmatpush3.bf16.msra.mxu1 %v491_v26 }
  0x43   :  { %457 = vmatprep.subr.bf16.mxu1 %v600_v4  ;;  %p575_p0 = pnand %p574_p13, %p568_p10 }
  0x44   :  { %438 = vmatpush3.bf16.msra.mxu0 %v484_v19 }
  0x45   :  { %439 = vmatprep.subr.bf16.mxu0 %v600_v4 }
  0x46   :  { %458 = vmatpush3.bf16.msra.mxu1 %v492_v27 }
  0x47   :  { %459 = vmatprep.subr.bf16.mxu1 %v600_v4 }
  0x48   :  { %440 = vmatpush3.bf16.msra.mxu0 %v485_v20 }
  0x49   :  { %441 = vmatprep.subr.bf16.mxu0 %v600_v4 }
  0x4a   :  { %460 = vmatpush3.bf16.msra.mxu1 %v493_v28 }
  0x4b   :  { %461 = vmatprep.subr.bf16.mxu1 %v600_v4 }
  0x4c   :  { %442 = vmatpush3.bf16.msra.mxu0 %v486_v21 }
  0x4d   :  { %443 = vmatprep.subr.bf16.mxu0 %v600_v4 }
  0x4e   :  { %462 = vmatpush3.bf16.msra.mxu1 %v494_v46 }
  0x4f   :  { %463 = vmatprep.subr.bf16.mxu1 %v600_v4 }
  0x50   :  { %444 = vmatpush3.bf16.msra.mxu0 %v487_v22 }
  0x51   :  { %445 = vmatprep.subr.bf16.mxu0 %v600_v4 }
  0x52   :  { %464 = vmatpush3.bf16.msra.mxu1 %v495_v47 }
  0x53   :  { %465 = vmatprep.subr.bf16.mxu1 %v600_v4 }
  0x54   :  { %446 = vmatpush3.bf16.msra.mxu0 %v488_v23 }
  0x56   :  { %466 = vmatpush3.bf16.msra.mxu1 %v496_v48 }
  0xc6   :  { %v81_v7 = vpop.xlane.xlu0 %80 }
  0xc7   :  { %v84_v8 = vmul.f32 0.03125, %v81_v7 }
  0xc9   :  { %v86_v9 = vsub.f32 %v411_v1, %v84_v8 }
  0xca   :  { %v83_v10 = vpop.xlane.xlu0 %82 }
  0xcb   :  { %v85_v11 = vmul.f32 0.03125, %v83_v10  ;;  %v88_v12 = vsel %vm79_vm0, %v86_v9, 0.0 }
  0xcc   :  { %v90_v13 = vmul.f32 %v88_v12, %v88_v12 }
  0xcd   :  { %v87_v14 = vsub.f32 %v412_v2, %v85_v11 }
  0xce   :  { %92 = vadd.xlane.f32.xlu1 %v90_v13 }
  0xcf   :  { %v89_v15 = vsel %vm79_vm0, %v87_v14, 0.0 }
  0xd0   :  { %v91_v16 = vmul.f32 %v89_v15, %v89_v15 }
  0xd2   :  { %94 = vadd.xlane.f32.xlu1 %v91_v16 }
 0x15b   :  { %v93_v29 = vpop.xlane.xlu1 %92 }
 0x15c   :  { %v96_v30 = vmul.f32 0.03125, %v93_v29 }
 0x15e   :  { %v98_v31 = vadd.f32 1e-05, %v96_v30 }
 0x15f   :  { %v95_v32 = vpop.xlane.xlu1 %94 }
 0x160   :  { %497 = vrsqrt.f32 %v98_v31  ;;  %v97_v33 = vmul.f32 0.03125, %v95_v32 }
 0x162   :  { %v99_v34 = vadd.f32 1e-05, %v97_v33 }
 0x164   :  { %499 = vrsqrt.f32 %v99_v34 }
 0x16a   :  { %v498_v35 = vpop.eup %497 }
 0x16b   :  { %v102_v36 = vmul.f32 %v498_v35, %v88_v12 }
 0x16d   :  { %v111_v40 = vmul.f32 %v389_v37, %v102_v36 }
 0x16e   :  { %v500_v38 = vpop.eup %499 }
 0x16f   :  { %v103_v39 = vmul.f32 %v500_v38, %v89_v15  ;;  %v120_v43 = vadd.f32 %v390_v41, %v111_v40 }
 0x171   :  { %v112_v42 = vmul.f32 %v389_v37, %v103_v39 }
 0x173   :  { %v121_v44 = vadd.f32 %v390_v41, %v112_v42 }
 0x175   :  { %v122_v45 = vpack.c.bf16 %v121_v44, %v120_v43 }
 0x177   :  { %448 = vmatmul.mubr.bf16.vlgmr.msra.gmra.mrb[0].mxu0 %v122_v45 }
 0x24a   :  { %v232_v50 = vpop.f32.mrb[0].mxu0 }
 0x24b   :  { %v233_v51 = vadd.f32 %v391_v49, %v232_v50  ;;  %v449_v52 = vpop.f32.mrb[1].mxu0 }
 0x24c   :  { %v235_v53 = vpop.f32.mrb[2].mxu0 }
 0x24d   :  { %v239_v54 = vmax.f32 %v233_v51, 0.0  ;;  %v236_v55 = vadd.f32 %v391_v49, %v235_v53  ;;  %v450_v56 = vpop.f32.mrb[3].mxu0 }
 0x24f   :  { %v240_v57 = vmax.f32 %v236_v55, 0.0  ;;  %v241_v58 = vmul.f32 %v239_v54, %v239_v54 }
 0x251   :  { %v242_v59 = vmul.f32 %v240_v57, %v240_v57 }
 0x253   :  { %v245_v60 = vpack.c.bf16 %v242_v59, %v241_v58 }
 0x255   :  { %468 = vmatmul.mubr.bf16.vlgmr.msra.gmra.mrb[0].mxu1 %v245_v60 }
 0x328   :  { %v344_v62 = vpop.f32.mrb[0].mxu1 }
 0x329   :  { %v367_v63 = vadd.f32 %v408_v61, %v344_v62  ;;  %v469_v0 = vpop.f32.mrb[1].mxu1 }
 0x32a   :  { %v347_v1 = vpop.f32.mrb[2].mxu1 }
 0x32b   :  { %369 = vst [vmem:[#allocation10] sm:$0xff] %v367_v63  ;;  %v368_v2 = vadd.f32 %v408_v61, %v347_v1  ;;  %v470_v3 = vpop.f32.mrb[3].mxu1 }
 0x32d   :  { %370 = vst [vmem:[#allocation10 + $0x8] sm:$0xff] %v368_v2 }
 0x32e   :  { %578 = shalt.err (!%p575_p0)
}
 0x32f   :  { %s579_s22 = scalar_lea.hbm %s746_s7, 256 }
 0x330   :  { %p580_p1 = scmp.ne.s32.totalorder %s746_s7, %s579_s22  ;;  %p583_p2 = scmp.lt.u32.totalorder %s579_s22, %s746_s7 }
 0x332   :  { %p585_p3 = pnand %p583_p2, %p580_p1 }
 0x334   :  { %588 = shalt.err (!%p585_p3)
}
 0x335   :  { %s603_s26 = smov 128   ;;  %s604_s28 = smov 8  }
 0x336   :  { %382 = dma.vmem_to_hbm [thread:$0]  %s377_s20, 256, %s746_s7, [#allocation6], %s603_s26, %s603_s26, %s604_s28  }
 0x337   :  { %593 = dma.done.wait [#allocation6], 256  }
 0x338   :  { %594 = vsyncadd [#allocation6], 4294967040 }
 0x339   :  { %386 = vsyncpa [#allocation5], 1 }
 0x33a   :  { %387 = vsyncpa [#allocation8], 1 }
 0x33b   :  { %388 = vsyncpa [#allocation6], 1 }

</bundles_post_ra>
